<compile_context>
chip_gen: v5e
topology: v5e:2x2
jax: 0.10.0
libtpu: 0.0.40
codegen_flags: <defaults>
</compile_context>

<pallas_src>
import jax
import jax.numpy as jnp
from jax.experimental import pallas as pl
from jax.experimental.pallas import tpu as pltpu

HIDDEN = 128


def pg_forward_kernel(x_ref, w1_ref, b1_ref, w2_ref, b2_ref, mu_ref):
    # linear1: [tb, obs] @ [obs, 128] -> f32 accumulate on the MXU.
    h = jnp.dot(x_ref[...], w1_ref[...], preferred_element_type=jnp.float32)
    # TODO(synk): dropout(p=0.6) is identity in eval mode; a training-mode mask
    # (pltpu.prng_seed + pltpu.prng_random_bits + 1/(1-p) scaling) is not implemented.
    h = jnp.maximum(h + b1_ref[...], 0.0)                       # bias + ReLU, f32 epilogue
    # linear2: [tb, 128] @ [128, act_dim] -> narrow output (masked vst, tiny DMA).
    mu = jnp.dot(h.astype(w2_ref.dtype), w2_ref[...],
                 preferred_element_type=jnp.float32)
    mu_ref[...] = (mu + b2_ref[...]).astype(mu_ref.dtype)


def prepare_params(w1, b1, w2, b2, log_std, *, compute_dtype=jnp.float32):
    """One-time parameter preprocessing, hoisted out of the per-step forward.

    w1: [obs_dim, 128], b1: [128] or [1, 128]
    w2: [128, act_dim], b2: [act_dim] or [1, act_dim]
    log_std: [act_dim] or [1, act_dim]
    """
    return {
        "w1": w1.astype(compute_dtype),
        "b1": jnp.asarray(b1, jnp.float32).reshape(1, -1),
        "w2": w2.astype(compute_dtype),
        "b2": jnp.asarray(b2, jnp.float32).reshape(1, -1),
        "std": jnp.exp(jnp.asarray(log_std, jnp.float32)).reshape(-1),
    }


def _round_up(v, m):
    return ((v + m - 1) // m) * m


def _pick_tile(B, tile_b):
    """Sublane-aligned batch tile; >=2 tiles for large batches (v7x: 2 TensorCores)."""
    tb = _round_up(min(B, tile_b), 8)
    if pl.cdiv(B, tb) < 2 and B >= 1024:
        tb = _round_up(pl.cdiv(B, 2), 8)
    return tb


def pg_agent_forward(x, params, *, tile_b=1024):
    """Returns (mu, std) parameterizing Normal(mu, std), like PG_agent.forward.

    x: [B, obs_dim]. For bf16 compute, x should already be bf16 at its producer
    (casting it here would add an extra HBM pass and erase the bandwidth win).
    """
    B, obs_dim = x.shape
    w1, b1, w2, b2 = params["w1"], params["b1"], params["w2"], params["b2"]
    hidden = w1.shape[1]
    act_dim = w2.shape[1]

    tb = _pick_tile(B, tile_b)
    grid = (pl.cdiv(B, tb),)

    mu = pl.pallas_call(
        pg_forward_kernel,
        out_shape=jax.ShapeDtypeStruct((B, act_dim), jnp.float32),
        grid=grid,
        in_specs=[
            pl.BlockSpec((tb, obs_dim), lambda i: (i, 0)),       # x tile (ragged last block ok)
            pl.BlockSpec((obs_dim, hidden), lambda i: (0, 0)),   # w1 (VMEM-resident)
            pl.BlockSpec((1, hidden), lambda i: (0, 0)),         # b1 (resident)
            pl.BlockSpec((hidden, act_dim), lambda i: (0, 0)),   # w2 (resident)
            pl.BlockSpec((1, act_dim), lambda i: (0, 0)),        # b2 (resident)
        ],
        out_specs=pl.BlockSpec((tb, act_dim), lambda i: (i, 0)), # narrow mu, no padded write
        compiler_params=pltpu.CompilerParams(
            dimension_semantics=("parallel",),                   # v7x: split tiles across 2 TCs
        ),
    )(x, w1, b1, w2, b2)

    return mu, params["std"]


def init_params(key, obs_dim, act_dim):
    """Deterministic init mimicking nn.Linear's U(-1/sqrt(fan_in), 1/sqrt(fan_in))."""
    k1, k2, k3, k4 = jax.random.split(key, 4)
    lim1 = 1.0 / jnp.sqrt(obs_dim)
    lim2 = 1.0 / jnp.sqrt(HIDDEN)
    w1 = jax.random.uniform(k1, (obs_dim, HIDDEN), jnp.float32, -lim1, lim1)
    b1 = jax.random.uniform(k2, (HIDDEN,), jnp.float32, -lim1, lim1)
    w2 = jax.random.uniform(k3, (HIDDEN, act_dim), jnp.float32, -lim2, lim2)
    b2 = jax.random.uniform(k4, (act_dim,), jnp.float32, -lim2, lim2)
    log_std = jnp.full((act_dim,), -2.0, dtype=jnp.float32)      # -2 * ones(act_space)
    return w1, b1, w2, b2, log_std


def _reference(x, w1, b1, w2, b2, log_std):
    h = jnp.maximum(x @ w1 + b1[None, :], 0.0)
    return h @ w2 + b2[None, :], jnp.exp(log_std)


if __name__ == "__main__":
    key = jax.random.PRNGKey(0)
    obs_dim, act_dim = 32, 8
    k_p, k_x, k_x2, k_x3 = jax.random.split(key, 4)
    w1, b1, w2, b2, log_std = init_params(k_p, obs_dim, act_dim)
    params = prepare_params(w1, b1, w2, b2, log_std)             # hoisted one-time prep

    # --- small batch, single tile ------------------------------------------
    B = 8
    x = jax.random.normal(k_x, (B, obs_dim), dtype=jnp.float32)
    mu, std = pg_agent_forward(x, params)
    jax.block_until_ready((mu, std))
    mu_ref, std_ref = _reference(x, w1, b1, w2, b2, log_std)
    assert mu.shape == (B, act_dim) and std.shape == (act_dim,)
    assert jnp.allclose(mu, mu_ref, atol=1e-5)
    assert jnp.allclose(std, std_ref, atol=1e-6)

    # --- non-multiple-of-8 batch: single ragged block (masked OOB write) ----
    B2 = 5
    x2 = jax.random.normal(k_x2, (B2, obs_dim), dtype=jnp.float32)
    mu2, _ = pg_agent_forward(x2, params)
    jax.block_until_ready(mu2)
    mu2_ref, _ = _reference(x2, w1, b1, w2, b2, log_std)
    assert mu2.shape == (B2, act_dim)
    assert jnp.allclose(mu2, mu2_ref, atol=1e-5)

    # --- multi-tile grid with ragged last block (forced small tile) ---------
    B3 = 200
    x3 = jax.random.normal(k_x3, (B3, obs_dim), dtype=jnp.float32)
    mu3, _ = pg_agent_forward(x3, params, tile_b=64)
    jax.block_until_ready(mu3)
    mu3_ref, _ = _reference(x3, w1, b1, w2, b2, log_std)
    assert mu3.shape == (B3, act_dim)
    assert jnp.allclose(mu3, mu3_ref, atol=1e-4)

    print("KERNEL_OK")
</pallas_src>

<mosaic_0001>
module attributes {stable_mosaic.version = 11 : i64} {
  func.func @pg_forward_kernel(%arg0: i32, %arg1: memref<8x32xf32, #tpu.memory_space<vmem>>, %arg2: memref<32x128xf32, #tpu.memory_space<vmem>>, %arg3: memref<1x128xf32, #tpu.memory_space<vmem>>, %arg4: memref<128x8xf32, #tpu.memory_space<vmem>>, %arg5: memref<1x8xf32, #tpu.memory_space<vmem>>, %arg6: memref<8x8xf32, #tpu.memory_space<vmem>>) attributes {dimension_semantics = [#tpu.dimension_semantics<parallel>], iteration_bounds = array<i64: 1>, scalar_prefetch = 0 : i64, scratch_operands = 0 : i64, tpu.core_type = #tpu.core_type<tc>, window_params = [{transform_indices = @transform_0, window_bounds = array<i64: 8, 32>}, {pipeline_mode = #tpu.pipeline_mode<synchronous>, transform_indices = @transform_1, window_bounds = array<i64: 32, 128>}, {pipeline_mode = #tpu.pipeline_mode<synchronous>, transform_indices = @transform_2, window_bounds = array<i64: 1, 128>}, {pipeline_mode = #tpu.pipeline_mode<synchronous>, transform_indices = @transform_3, window_bounds = array<i64: 128, 8>}, {pipeline_mode = #tpu.pipeline_mode<synchronous>, transform_indices = @transform_4, window_bounds = array<i64: 1, 8>}, {transform_indices = @transform_5, window_bounds = array<i64: 8, 8>}]} {
    %c0 = arith.constant 0 : index
    %c0_0 = arith.constant 0 : index
    %0 = vector.load %arg1[%c0, %c0_0] : memref<8x32xf32, #tpu.memory_space<vmem>>, vector<8x32xf32>
    %c0_1 = arith.constant 0 : index
    %c0_2 = arith.constant 0 : index
    %1 = vector.load %arg2[%c0_1, %c0_2] : memref<32x128xf32, #tpu.memory_space<vmem>>, vector<32x128xf32>
    %cst = arith.constant dense<0.000000e+00> : vector<8x128xf32>
    %2 = tpu.matmul %0, %1, %cst {dimension_numbers = #tpu.dot_dimension_numbers<[1], [0], [0], [1], [0, 0, 1, 1], [], []>} : vector<8x32xf32>, vector<32x128xf32>, vector<8x128xf32> -> vector<8x128xf32>
    %c0_3 = arith.constant 0 : index
    %c0_4 = arith.constant 0 : index
    %3 = vector.load %arg3[%c0_3, %c0_4] : memref<1x128xf32, #tpu.memory_space<vmem>>, vector<1x128xf32>
    %4 = vector.broadcast %3 : vector<1x128xf32> to vector<8x128xf32>
    %5 = arith.addf %2, %4 : vector<8x128xf32>
    %cst_5 = arith.constant 0.000000e+00 : f32
    %6 = vector.broadcast %cst_5 : f32 to vector<8x128xf32>
    %7 = arith.maximumf %5, %6 : vector<8x128xf32>
    %c0_6 = arith.constant 0 : index
    %c0_7 = arith.constant 0 : index
    %8 = vector.load %arg4[%c0_6, %c0_7] : memref<128x8xf32, #tpu.memory_space<vmem>>, vector<128x8xf32>
    %cst_8 = arith.constant dense<0.000000e+00> : vector<8x8xf32>
    %9 = tpu.matmul %7, %8, %cst_8 {dimension_numbers = #tpu.dot_dimension_numbers<[1], [0], [0], [1], [0, 0, 1, 1], [], []>} : vector<8x128xf32>, vector<128x8xf32>, vector<8x8xf32> -> vector<8x8xf32>
    %c0_9 = arith.constant 0 : index
    %c0_10 = arith.constant 0 : index
    %10 = vector.load %arg5[%c0_9, %c0_10] : memref<1x8xf32, #tpu.memory_space<vmem>>, vector<1x8xf32>
    %11 = vector.broadcast %10 : vector<1x8xf32> to vector<8x8xf32>
    %12 = arith.addf %9, %11 : vector<8x8xf32>
    %c0_11 = arith.constant 0 : index
    %c0_12 = arith.constant 0 : index
    %13 = vector.load %arg6[%c0_11, %c0_12] : memref<8x8xf32, #tpu.memory_space<vmem>>, vector<8x8xf32>
    tpu.vector_store %arg6[%c0_11, %c0_12], %12 {strides = array<i32>} : memref<8x8xf32, #tpu.memory_space<vmem>>, vector<8x8xf32>,
    return
  }
  func.func @transform_0(%arg0: i32) -> (i32, i32) {
    %c0_i32 = arith.constant 0 : i32
    %c0_i32_0 = arith.constant 0 : i32
    return %arg0, %c0_i32 : i32, i32
  }
  func.func @transform_1(%arg0: i32) -> (i32, i32) {
    %c0_i32 = arith.constant 0 : i32
    %c0_i32_0 = arith.constant 0 : i32
    %c0_i32_1 = arith.constant 0 : i32
    return %c0_i32, %c0_i32_0 : i32, i32
  }
  func.func @transform_2(%arg0: i32) -> (i32, i32) {
    %c0_i32 = arith.constant 0 : i32
    %c0_i32_0 = arith.constant 0 : i32
    %c0_i32_1 = arith.constant 0 : i32
    return %c0_i32, %c0_i32_0 : i32, i32
  }
  func.func @transform_3(%arg0: i32) -> (i32, i32) {
    %c0_i32 = arith.constant 0 : i32
    %c0_i32_0 = arith.constant 0 : i32
    %c0_i32_1 = arith.constant 0 : i32
    return %c0_i32, %c0_i32_0 : i32, i32
  }
  func.func @transform_4(%arg0: i32) -> (i32, i32) {
    %c0_i32 = arith.constant 0 : i32
    %c0_i32_0 = arith.constant 0 : i32
    %c0_i32_1 = arith.constant 0 : i32
    return %c0_i32, %c0_i32_0 : i32, i32
  }
  func.func @transform_5(%arg0: i32) -> (i32, i32) {
    %c0_i32 = arith.constant 0 : i32
    %c0_i32_0 = arith.constant 0 : i32
    return %arg0, %c0_i32 : i32, i32
  }
}

</mosaic_0001>

<bundles_post_ra>
// kernel: tpu_custom_call.1
= control target key start
LH: loop header
LB: loop body
LE: loop exit
PB: predicated region body
PF: predicated region fallthrough
CT: control target
= control target key end

     0   :  { %vm30_vm0 = vcmask 261120   ;;  %s246_s0 = inlined_call_operand.vmem [shape: f32[8,32], index: 0, kind: input, shape index: {}]   ;;  %s247_s1 = inlined_call_operand.vmem [shape: f32[32,128], index: 1, kind: input, shape index: {}]   ;;  %s248_s2 = inlined_call_operand.vmem [shape: f32[1,128], index: 2, kind: input, shape index: {}]   ;;  %s249_s3 = inlined_call_operand.vmem [shape: f32[128,8], index: 3, kind: input, shape index: {}]   ;;  %s250_s4 = inlined_call_operand.vmem [shape: f32[1,8], index: 4, kind: input, shape index: {}]   ;;  %s251_s5 = inlined_call_operand.hbm [shape: f32[8,8], index: 5, kind: output, shape index: {}]  }
   0x1   :  { %v25_v0 = vld [vmem:[%s247_s1 + $0x18] sm:$0xff]  ;;  %v24_v1 = vld [vmem:[%s247_s1 + $0x10] sm:$0xff]  ;;  %v23_v3 = vld [vmem:[%s247_s1 + $0x8] sm:$0xff] }
   0x2   :  { %46 = vmatpush.msra.mxu0 %v25_v0  ;;  %v70_v2 = vld [vmem:[%s249_s3 + $0x78] sm:$0xff]  ;;  %v69_v4 = vld [vmem:[%s249_s3 + $0x70] sm:$0xff]  ;;  %v68_v5 = vld [vmem:[%s249_s3 + $0x68] sm:$0xff] }
   0x3   :  { %75 = vmatpush.msra.mxu1 %v70_v2  ;;  %v22_v6 = vld [vmem:[%s247_s1] sm:$0xff]  ;;  %v66_v9 = vld [vmem:[%s249_s3 + $0x58] sm:$0xff] }
   0x4   :  { %47 = vmatpush.msra.mxu0 %v24_v1  ;;  %v21_v7 = vld [vmem:[%s246_s0] sm:$0xff] }
   0x5   :  { %76 = vmatpush.msra.mxu1 %v69_v4  ;;  %v67_v8 = vld [vmem:[%s249_s3 + $0x60] sm:$0xff] }
   0x6   :  { %48 = vmatpush.msra.mxu0 %v23_v3 }
   0x7   :  { %77 = vmatpush.msra.mxu1 %v68_v5 }
   0x8   :  { %49 = vmatpush.msra.mxu0 %v22_v6 }
   0x9   :  { %10 = vsyncpa [#allocation3], 0  ;;  %113 = vmatmul.msk.f32.vlgmr.msra.gmra.mxu0 %vm30_vm0, %v21_v7  ;;  %78 = vmatpush.msra.mxu1 %v67_v8  ;;  %v65_v10 = vld [vmem:[%s249_s3 + $0x50] sm:$0xff]  ;;  %v64_v11 = vld [vmem:[%s249_s3 + $0x48] sm:$0xff]  ;;  %s143_s12 = smov [#allocation2]   ;;  %s104_s14 = sshll.u32 %s251_s5, 4  ;;  %s105_s14 = int_to_ptr.hbm [resolvable:$true] %s104_s14 }
   0xa   :  { %v63_v12 = vld [vmem:[%s249_s3 + $0x40] sm:$0xff]  ;;  %v62_v13 = vld [vmem:[%s249_s3 + $0x38] sm:$0xff]  ;;  %v61_v14 = vld [vmem:[%s249_s3 + $0x30] sm:$0xff]  ;;  %s102_s1 = sshll.u32 %s143_s12, 4  ;;  %vm95_vm1 = vcmask 64512   ;;  %s103_s1 = int_to_ptr.vmem [resolvable:$true] %s102_s1 }
   0xb   :  { %79 = vmatpush.msra.mxu1 %v66_v9  ;;  %v60_v15 = vld [vmem:[%s249_s3 + $0x28] sm:$0xff]  ;;  %v59_v16 = vld [vmem:[%s249_s3 + $0x20] sm:$0xff]  ;;  %v58_v17 = vld [vmem:[%s249_s3 + $0x18] sm:$0xff] }
   0xc   :  { %v57_v18 = vld [vmem:[%s249_s3 + $0x10] sm:$0xff]  ;;  %v56_v19 = vld [vmem:[%s249_s3 + $0x8] sm:$0xff]  ;;  %v55_v20 = vld [vmem:[%s249_s3] sm:$0xff] }
   0xd   :  { %80 = vmatpush.msra.mxu1 %v65_v10  ;;  %v115_v21 = vld [vmem:[%s248_s2] ss:$0 sm:$0xff] }
   0xe   :  { %v116_v25 = vld [vmem:[%s250_s4] ss:$0 sm:$0xff] }
   0xf   :  { %81 = vmatpush.msra.mxu1 %v64_v11 }
  0x11   :  { %82 = vmatpush.msra.mxu1 %v63_v12 }
  0x13   :  { %83 = vmatpush.msra.mxu1 %v62_v13 }
  0x15   :  { %84 = vmatpush.msra.mxu1 %v61_v14 }
  0x17   :  { %85 = vmatpush.msra.mxu1 %v60_v15 }
  0x19   :  { %86 = vmatpush.msra.mxu1 %v59_v16 }
  0x1b   :  { %87 = vmatpush.msra.mxu1 %v58_v17 }
  0x1d   :  { %88 = vmatpush.msra.mxu1 %v57_v18 }
  0x1f   :  { %89 = vmatpush.msra.mxu1 %v56_v19 }
  0x21   :  { %90 = vmatpush.msra.mxu1 %v55_v20 }
  0x86   :  { %v51_v22 = vpop.f32.mrf.mxu0 }
  0x87   :  { %v52_v23 = vadd.f32 %v115_v21, %v51_v22 }
  0x89   :  { %v54_v24 = vmax.f32 %v52_v23, 0.0 }
  0x8b   :  { %91 = vmatmul.f32.vlgmr.msra.gmra.mxu1 %v54_v24 }
 0x108   :  { %v92_v26 = vpop.f32.mrf.mxu1 }
 0x109   :  { %v93_v27 = vadd.f32 %v116_v25, %v92_v26 }
 0x10b   :  { %96 = vst.msk [vmem:[#allocation2] sm:$0xff] %vm95_vm1, %v93_v27 }
 0x10c   :  { %107 = dma.vmem_to_hbm [thread:$0]  %s103_s1, 128, %s105_s14, [#allocation3]  }
 0x10d   :  { %141 = dma.done.wait [#allocation3], 128  }
 0x10e   :  { %142 = vsyncadd [#allocation3], 4294967168 }
 0x10f   :  { %112 = vsyncpa [#allocation3], 1 }

</bundles_post_ra>
